<compile_context>
chip_gen: v6e
topology: v6e:2x2x1
jax: 0.10.0
libtpu: 0.0.40
codegen_flags: <defaults>
</compile_context>

<pallas_src>
import jax
import jax.numpy as jnp
from jax.experimental import pallas as pl
from jax.experimental.pallas import tpu as pltpu


def simple_model_kernel(w_ref, out_ref):
    w1 = w_ref[0]
    w2 = w_ref[1]
    d1 = w1 - 1.0
    d2 = w2 + 0.5
    out_ref[0] = d1 * d1 + d2 * d2


_simple_model_call = pl.pallas_call(
    simple_model_kernel,
    out_shape=jax.ShapeDtypeStruct((1,), jnp.float32),
    in_specs=[pl.BlockSpec(memory_space=pltpu.SMEM)],
    out_specs=pl.BlockSpec(memory_space=pltpu.SMEM),
    cost_estimate=pl.CostEstimate(flops=5, transcendentals=0, bytes_accessed=12),
)


@jax.jit
def simple_model_forward(params):
    """params: f32[2] = [w1, w2]. Returns f32[1] loss."""
    return _simple_model_call(params)


if __name__ == "__main__":
    # Deterministic parameter initialization matching the PyTorch module
    # __init__ (fixed constants). PRNGKey(0) created for protocol consistency.
    _ = jax.random.PRNGKey(0)
    # w1 = -2.0, w2 = 3.0, packed into a single f32[2] array so the jitted
    # forward has exactly one operand and no reshape/astype ops around the
    # pallas_call.
    params = jnp.array([-2.0, 3.0], dtype=jnp.float32)

    result_1d = simple_model_forward(params)
    result_1d = jax.block_until_ready(result_1d)

    result = result_1d[0]
    expected = (params[0] - 1.0) ** 2 + (params[1] + 0.5) ** 2  # 9 + 12.25 = 21.25
    assert jnp.allclose(result, expected), (result, expected)
    print("KERNEL_OK")
</pallas_src>

<mosaic_0001>
module attributes {stable_mosaic.version = 11 : i64} {
  func.func @simple_model_kernel(%arg0: memref<2xf32, #tpu.memory_space<smem>>, %arg1: memref<1xf32, #tpu.memory_space<smem>>) attributes {dimension_semantics = [], scalar_prefetch = 0 : i64, scratch_operands = 0 : i64, tpu.core_type = #tpu.core_type<tc>} {
    %c0 = arith.constant 0 : index
    %0 = memref.load %arg0[%c0] : memref<2xf32, #tpu.memory_space<smem>>
    %c1 = arith.constant 1 : index
    %1 = memref.load %arg0[%c1] : memref<2xf32, #tpu.memory_space<smem>>
    %cst = arith.constant 1.000000e+00 : f32
    %2 = arith.subf %0, %cst : f32
    %cst_0 = arith.constant 5.000000e-01 : f32
    %3 = arith.addf %1, %cst_0 : f32
    %4 = arith.mulf %2, %2 : f32
    %5 = arith.mulf %3, %3 : f32
    %6 = arith.addf %4, %5 : f32
    %c0_1 = arith.constant 0 : index
    %7 = memref.load %arg1[%c0_1] : memref<1xf32, #tpu.memory_space<smem>>
    memref.store %6, %arg1[%c0_1] : memref<1xf32, #tpu.memory_space<smem>>
    return
  }
}

</mosaic_0001>

<bundles_post_ra>
// kernel: simple_model_forward.1
= control target key start
LH: loop header
LB: loop body
LE: loop exit
PB: predicated region body
PF: predicated region fallthrough
CT: control target
= control target key end

     0   :  { %6 = vsyncpa [#allocation3], 0  ;;  %s85_s0 = inlined_call_operand.hbm [shape: f32[2], index: 0, kind: input, shape index: {}]   ;;  %s86_s1 = inlined_call_operand.hbm [shape: f32[1], index: 1, kind: output, shape index: {}]  }
   0x1   :  { %7 = vsyncpa [#allocation4], 0  ;;  %s67_s6 = smov [#allocation2]  }
   0x2   :  { %15 = dma.hbm_to_smem %s85_s0, 16, %s67_s6, [#allocation3]  }
   0x3   :  { %63 = dma.done.wait [#allocation3], 16  }
   0x4   :  { %64 = vsyncadd [#allocation3], 4294967280 }
   0x5   :  { %19 = sfence }
   0x6   :  { %s20_s9 = sld [smem:[#allocation2]]  ;;  %s68_s16 = smov [#allocation5]  }
   0x7   :  { %s43_s10 = sld [smem:[#allocation2 + $0x1]] }
   0xc   :  { %s44_s11 = sadd.f32 -1.0, %s20_s9 }
   0xd   :  { %s23_s12 = sadd.f32 0.5, %s43_s10 }
   0xe   :  { %s24_s13 = smul.f32 %s44_s11, %s44_s11 }
   0xf   :  { %s25_s14 = smul.f32 %s23_s12, %s23_s12 }
  0x11   :  { %s26_s15 = sadd.f32 %s25_s14, %s24_s13 }
  0x13   :  { %28 = sst [smem:[#allocation5]] %s26_s15 }
  0x14   :  { %36 = dma.smem_to_hbm %s68_s16, 16, %s86_s1, [#allocation4]  }
  0x15   :  { %65 = dma.done.wait [#allocation4], 16  }
  0x16   :  { %66 = vsyncadd [#allocation4], 4294967280 }
  0x17   :  { %40 = sfence }
  0x18   :  { %41 = vsyncpa [#allocation3], 1 }
  0x19   :  { %42 = vsyncpa [#allocation4], 1 }

</bundles_post_ra>
